<compile_context>
chip_gen: v7x
topology: tpu7x:2x2x1
jax: 0.10.0
libtpu: 0.0.40
codegen_flags: <defaults>
</compile_context>

<pallas_src>
import functools

import jax
import jax.numpy as jnp
from jax import lax
from jax.experimental import pallas as pl
from jax.experimental.pallas import tpu as pltpu


def _round_up(x, m):
    return (x + m - 1) // m * m


def _choose_tiles(M, Dout, Din, itemsize):
    # tm: sublane-aligned (multiple of 8); tn/tk: lane-aligned (multiple of 128).
    tm = min(_round_up(M, 8), 256)
    tn = min(_round_up(Dout, 128), 512)
    tk = min(_round_up(Din, 128), 512 if itemsize >= 4 else 1024)
    return tm, tn, tk


def _multi_head_kernel(x_ref, w_ref, o_ref, acc_ref):
    # x_ref: (tm, tk)    w_ref: (tn, tk)  [PyTorch (out, in) layout]
    # o_ref: (tm, tn)    acc_ref: (tm, tn) f32 scratch
    @pl.when(pl.program_id(3) == 0)
    def _():
        acc_ref[...] = jnp.zeros_like(acc_ref)

    # x @ w.T natively on the MXU: contract the last dim of both operands.
    acc_ref[...] += lax.dot_general(
        x_ref[...], w_ref[...],
        dimension_numbers=(((1,), (1,)), ((), ())),
        preferred_element_type=jnp.float32,
    )

    @pl.when(pl.program_id(3) == pl.num_programs(3) - 1)
    def _():
        o_ref[...] = acc_ref[...].astype(o_ref.dtype)


@functools.partial(jax.jit, static_argnames=("compute_dtype",))
def _multi_lm_head_jit(x, w, compute_dtype=None):
    """x: (B, S, Din), w: (H, Dout, Din) -> tuple of H arrays (B, S, Dout)."""
    B, S, Din = x.shape
    H, Dout, _ = w.shape
    out_dtype = x.dtype
    M = B * S

    x2d = x.reshape(M, Din)
    if compute_dtype is not None:
        x2d = x2d.astype(compute_dtype)
        w = w.astype(compute_dtype)

    itemsize = jnp.dtype(x2d.dtype).itemsize
    tm, tn, tk = _choose_tiles(M, Dout, Din, itemsize)
    Mp, Np, Kp = _round_up(M, tm), _round_up(Dout, tn), _round_up(Din, tk)

    if (Mp, Kp) != (M, Din):
        x2d = jnp.pad(x2d, ((0, Mp - M), (0, Kp - Din)))
    if (Np, Kp) != (Dout, Din):
        w = jnp.pad(w, ((0, 0), (0, Np - Dout), (0, Kp - Din)))

    grid = (H, Mp // tm, Np // tn, Kp // tk)

    # Double-buffered input/output tiles + f32 accumulator, with headroom.
    vmem_bytes = 2 * (tm * tk + tn * tk + tm * tn) * itemsize + tm * tn * 4
    vmem_limit = min(100 * 1024 * 1024,
                     max(32 * 1024 * 1024, int(vmem_bytes * 2)))

    out = pl.pallas_call(
        _multi_head_kernel,
        out_shape=jax.ShapeDtypeStruct((H, Mp, Np), out_dtype),
        grid_spec=pltpu.PrefetchScalarGridSpec(
            num_scalar_prefetch=0,
            grid=grid,
            in_specs=[
                # Shared activation tile: independent of head / N-tile index.
                pl.BlockSpec((tm, tk), lambda h, m, n, k: (m, k)),
                # Per-head weight tile in PyTorch (out, in) layout.
                pl.BlockSpec((None, tn, tk), lambda h, m, n, k: (h, n, k)),
            ],
            out_specs=pl.BlockSpec(
                (None, tm, tn), lambda h, m, n, k: (h, m, n)
            ),
            scratch_shapes=[pltpu.VMEM((tm, tn), jnp.float32)],
        ),
        compiler_params=pltpu.CompilerParams(
            dimension_semantics=("parallel", "parallel", "parallel",
                                 "arbitrary"),
            vmem_limit_bytes=vmem_limit,
        ),
    )(x2d, w)

    out = out[:, :M, :Dout].reshape(H, B, S, Dout)
    # Split into per-head outputs inside the same jit.
    return tuple(out[h] for h in range(H))


def pack_weights(weights):
    """Stack PyTorch-layout per-head weights (Dout, Din) once at init."""
    return jnp.stack(weights, axis=0)  # (H, Dout, Din) — no transpose needed


def multi_lm_head(x, weights, *, compute_dtype=None):
    """Pallas equivalent of MultiLMHead.forward.

    x:        (batch, seq, input_dim)
    weights:  list of (output_dim, input_dim) arrays (PyTorch Linear layout),
              or a pre-packed (head_num, output_dim, input_dim) array
              (preferred: pack once at init, not per forward call).
    returns:  list of (batch, seq, output_dim) arrays, one per head.
    """
    w = weights if isinstance(weights, jnp.ndarray) else pack_weights(weights)
    return list(_multi_lm_head_jit(x, w, compute_dtype=compute_dtype))


if __name__ == "__main__":
    key = jax.random.PRNGKey(0)

    def make_case(head_num, batch, seq, input_dim, output_dim, k):
        kx, kw = jax.random.split(k)
        x = jax.random.normal(kx, (batch, seq, input_dim), dtype=jnp.float32)
        bound = 1.0 / (input_dim ** 0.5)
        w = jax.random.uniform(kw, (head_num, output_dim, input_dim),
                               dtype=jnp.float32, minval=-bound, maxval=bound)
        return x, w

    k1, k2 = jax.random.split(key)

    # Case 1: small shapes consistent with the module (single tile per dim).
    head_num, batch, seq, input_dim, output_dim = 3, 2, 8, 32, 64
    x, w = make_case(head_num, batch, seq, input_dim, output_dim, k1)
    outs = multi_lm_head(x, w)
    outs = [jax.block_until_ready(o) for o in outs]
    refs = jnp.einsum("bsd,hod->hbso", x, w, precision=lax.Precision.HIGHEST)
    for h, o in enumerate(outs):
        assert o.shape == (batch, seq, output_dim)
        assert jnp.allclose(o, refs[h], atol=1e-4, rtol=1e-4)

    # Case 2: exercises multi-tile M/N/K grid, zero-padding and accumulation.
    x2, w2 = make_case(2, 2, 256, 640, 1100, k2)
    outs2 = multi_lm_head(x2, w2)
    outs2 = [jax.block_until_ready(o) for o in outs2]
    refs2 = jnp.einsum("bsd,hod->hbso", x2, w2,
                       precision=lax.Precision.HIGHEST)
    for h, o in enumerate(outs2):
        assert o.shape == (2, 256, 1100)
        assert jnp.allclose(o, refs2[h], atol=2e-2, rtol=2e-2)

    print("KERNEL_OK")
</pallas_src>

<mosaic_0001>
module attributes {stable_mosaic.version = 11 : i64} {
  func.func @_multi_head_kernel(%arg0: i32, %arg1: i32, %arg2: i32, %arg3: i32, %arg4: memref<16x128xf32, #tpu.memory_space<vmem>>, %arg5: memref<1x128x128xf32, #tpu.memory_space<vmem>>, %arg6: memref<1x16x128xf32, #tpu.memory_space<vmem>>, %arg7: memref<16x128xf32, #tpu.memory_space<vmem>>) attributes {dimension_semantics = [#tpu.dimension_semantics<parallel>, #tpu.dimension_semantics<parallel>, #tpu.dimension_semantics<parallel>, #tpu.dimension_semantics<arbitrary>], iteration_bounds = array<i64: 3, 1, 1, 1>, scalar_prefetch = 0 : i64, scratch_operands = 1 : i64, tpu.core_type = #tpu.core_type<tc>, window_params = [{transform_indices = @transform_0, window_bounds = array<i64: 16, 128>}, {transform_indices = @transform_1, window_bounds = array<i64: 1, 128, 128>}, {transform_indices = @transform_2, window_bounds = array<i64: 1, 16, 128>}]} {
    %c0_i32 = arith.constant 0 : i32
    %0 = arith.cmpi eq, %arg3, %c0_i32 : i32
    %1 = arith.extui %0 : i1 to i32
    %c0_i32_0 = arith.constant 0 : i32
    %2 = arith.cmpi ne, %1, %c0_i32_0 : i32
    scf.if %2 {
      %cst_11 = arith.constant 0.000000e+00 : f32
      %13 = vector.broadcast %cst_11 : f32 to vector<16x128xf32>
      %c0_12 = arith.constant 0 : index
      %c0_13 = arith.constant 0 : index
      %14 = vector.load %arg7[%c0_12, %c0_13] : memref<16x128xf32, #tpu.memory_space<vmem>>, vector<16x128xf32>
      tpu.vector_store %arg7[%c0_12, %c0_13], %13 {strides = array<i32>} : memref<16x128xf32, #tpu.memory_space<vmem>>, vector<16x128xf32>,
    } else {
    }
    %c0 = arith.constant 0 : index
    %c0_1 = arith.constant 0 : index
    %3 = vector.load %arg7[%c0, %c0_1] : memref<16x128xf32, #tpu.memory_space<vmem>>, vector<16x128xf32>
    %c0_2 = arith.constant 0 : index
    %c0_3 = arith.constant 0 : index
    %4 = vector.load %arg4[%c0_2, %c0_3] : memref<16x128xf32, #tpu.memory_space<vmem>>, vector<16x128xf32>
    %c0_4 = arith.constant 0 : index
    %c0_5 = arith.constant 0 : index
    %c0_6 = arith.constant 0 : index
    %5 = vector.load %arg5[%c0_4, %c0_5, %c0_6] : memref<1x128x128xf32, #tpu.memory_space<vmem>>, vector<1x128x128xf32>
    %6 = vector.shape_cast %5 : vector<1x128x128xf32> to vector<128x128xf32>
    %cst = arith.constant dense<0.000000e+00> : vector<16x128xf32>
    %7 = tpu.matmul %4, %6, %cst {dimension_numbers = #tpu.dot_dimension_numbers<[1], [1], [0], [0], [0, 0, 1, 0], [], []>} : vector<16x128xf32>, vector<128x128xf32>, vector<16x128xf32> -> vector<16x128xf32>
    %8 = arith.addf %3, %7 : vector<16x128xf32>
    %c0_7 = arith.constant 0 : index
    %c0_8 = arith.constant 0 : index
    %9 = vector.load %arg7[%c0_7, %c0_8] : memref<16x128xf32, #tpu.memory_space<vmem>>, vector<16x128xf32>
    tpu.vector_store %arg7[%c0_7, %c0_8], %8 {strides = array<i32>} : memref<16x128xf32, #tpu.memory_space<vmem>>, vector<16x128xf32>,
    %c0_i32_9 = arith.constant 0 : i32
    %10 = arith.cmpi eq, %arg3, %c0_i32_9 : i32
    %11 = arith.extui %10 : i1 to i32
    %c0_i32_10 = arith.constant 0 : i32
    %12 = arith.cmpi ne, %11, %c0_i32_10 : i32
    scf.if %12 {
      %c0_11 = arith.constant 0 : index
      %c0_12 = arith.constant 0 : index
      %13 = vector.load %arg7[%c0_11, %c0_12] : memref<16x128xf32, #tpu.memory_space<vmem>>, vector<16x128xf32>
      %c0_13 = arith.constant 0 : index
      %c0_14 = arith.constant 0 : index
      %c0_15 = arith.constant 0 : index
      %14 = vector.load %arg6[%c0_13, %c0_14, %c0_15] : memref<1x16x128xf32, #tpu.memory_space<vmem>>, vector<1x16x128xf32>
      %15 = vector.shape_cast %14 : vector<1x16x128xf32> to vector<16x128xf32>
      %16 = vector.shape_cast %13 : vector<16x128xf32> to vector<1x16x128xf32>
      tpu.vector_store %arg6[%c0_13, %c0_14, %c0_15], %16 {strides = array<i32>} : memref<1x16x128xf32, #tpu.memory_space<vmem>>, vector<1x16x128xf32>,
    } else {
    }
    return
  }
  func.func @transform_0(%arg0: i32, %arg1: i32, %arg2: i32, %arg3: i32) -> (i32, i32) {
    %c0_i32 = arith.constant 0 : i32
    return %arg1, %arg3 : i32, i32
  }
  func.func @transform_1(%arg0: i32, %arg1: i32, %arg2: i32, %arg3: i32) -> (i32, i32, i32) {
    %c0_i32 = arith.constant 0 : i32
    return %arg0, %arg2, %arg3 : i32, i32, i32
  }
  func.func @transform_2(%arg0: i32, %arg1: i32, %arg2: i32, %arg3: i32) -> (i32, i32, i32) {
    %c0_i32 = arith.constant 0 : i32
    return %arg0, %arg1, %arg2 : i32, i32, i32
  }
}

</mosaic_0001>

<bundles_post_ra>
// kernel: _multi_lm_head_jit.1
= control target key start
LH: loop header
LB: loop body
LE: loop exit
PB: predicated region body
PF: predicated region fallthrough
CT: control target
= control target key end

     0   :  { %s647_s9 = smov 0   ;;  %s649_s10 = smov 0   ;;  %s708_s0 = inlined_call_operand.vmem [shape: f32[16,128], index: 0, kind: input, shape index: {}]   ;;  %s709_s1 = inlined_call_operand.vmem [shape: f32[3,128,128], index: 1, kind: input, shape index: {}]   ;;  %s710_s2 = inlined_call_operand.vmem [shape: f32[3,16,128], index: 2, kind: output, shape index: {}]  }
   0x1   :  { %s651_s11 = smov 0  }
   0x2 LB: > { %s38_s12 = sadd.s32 1, %s626_s10  ;;  %p490_p0 = scmp.ge.s32.totalorder %s630_s11, 1  ;;  %s630_s11 = sphi %s651_s11, %s12_s11   ;;  %s626_s10 = sphi %s649_s10, %s712_s10   ;;  %s622_s9 = sphi %s647_s9, %s711_s9  }
   0x3   : > { %p40_p1 = scmp.ge.s32.totalorder %s38_s12, 3  ;;  %p170_p2 = scmp.lt.s32.totalorder %s630_s11, 4 }
   0x5   : > { %s714_s12 = smov (%p40_p1, %s38_s12), 0  ;;  %p171_p3 = pnand %p490_p0, %p170_p2 }
   0x6   : > { %p224_p4 = scmp.lt.s32.totalorder (!%p171_p3), %s622_s9, 2  ;;  %v257_v0 = vld [vmem:[%s708_s0] sm:$0xff] (!%p171_p3)  ;;  %v258_v25 = vld [vmem:[%s708_s0 + $0x8] sm:$0xff] (!%p171_p3) }
   0x7   : > { %174 = sbr.rel (%p171_p3) target bundleno = 298 (0x12a), region = 28  ;;  %549 = vmatprep.mubr.f32.mxu0 (!%p171_p3), %v257_v0 }
   0xe   : > { %s716_s9 = smov (!%p224_p4, %s622_s9), 2 }
   0xf   : > { %s497_s15 = sshll.u32 %s716_s9, 7  ;;  %s498_s21 = sshll.u32 %s716_s9, 4 }
  0x10   : > { %s674_s18 = scalar_lea.vmem %s709_s1, %s497_s15  ;;  %s247_s24 = scalar_lea.vmem %s710_s2, %s498_s21 }
  0x11   : > { %v259_v1 = vld [vmem:[%s674_s18] sm:$0xff]  ;;  %v260_v2 = vld [vmem:[%s674_s18 + $0x8] sm:$0xff]  ;;  %v261_v3 = vld [vmem:[%s674_s18 + $0x10] sm:$0xff] }
  0x12   : > { %v552_v4 = vpack.c.bf16 %v260_v2, %v259_v1  ;;  %v262_v5 = vld [vmem:[%s674_s18 + $0x18] sm:$0xff]  ;;  %v263_v7 = vld [vmem:[%s674_s18 + $0x20] sm:$0xff]  ;;  %v264_v8 = vld [vmem:[%s674_s18 + $0x28] sm:$0xff] }
  0x13   : > { %v556_v6 = vpack.c.bf16 %v262_v5, %v261_v3  ;;  %v560_v9 = vpack.c.bf16 %v264_v8, %v263_v7  ;;  %v265_v10 = vld [vmem:[%s674_s18 + $0x30] sm:$0xff]  ;;  %v266_v11 = vld [vmem:[%s674_s18 + $0x38] sm:$0xff]  ;;  %v267_v13 = vld [vmem:[%s674_s18 + $0x40] sm:$0xff] }
  0x14   : > { %553 = vmatprep.subr.bf16.mxu0 %v552_v4  ;;  %v564_v12 = vpack.c.bf16 %v266_v11, %v265_v10  ;;  %v268_v14 = vld [vmem:[%s674_s18 + $0x48] sm:$0xff]  ;;  %v269_v16 = vld [vmem:[%s674_s18 + $0x50] sm:$0xff]  ;;  %v270_v17 = vld [vmem:[%s674_s18 + $0x58] sm:$0xff] }
  0x15   : > { %555 = vmatpush3.bf16.xpose.msra.mxu0 %v552_v4  ;;  %v568_v15 = vpack.c.bf16 %v268_v14, %v267_v13  ;;  %v572_v18 = vpack.c.bf16 %v270_v17, %v269_v16  ;;  %v271_v19 = vld [vmem:[%s674_s18 + $0x60] sm:$0xff]  ;;  %v272_v20 = vld [vmem:[%s674_s18 + $0x68] sm:$0xff]  ;;  %v273_v22 = vld [vmem:[%s674_s18 + $0x70] sm:$0xff] }
  0x16   : > { %557 = vmatprep.subr.bf16.mxu0 %v556_v6  ;;  %v576_v21 = vpack.c.bf16 %v272_v20, %v271_v19  ;;  %v274_v23 = vld [vmem:[%s674_s18 + $0x78] sm:$0xff] }
  0x17   : > { %v580_v24 = vpack.c.bf16 %v274_v23, %v273_v22 }
  0x1d   : > { %559 = vmatpush3.bf16.xpose.msra.mxu0 %v556_v6 }
  0x1e   : > { %561 = vmatprep.subr.bf16.mxu0 %v560_v9 }
  0x25   : > { %563 = vmatpush3.bf16.xpose.msra.mxu0 %v560_v9 }
  0x26   : > { %565 = vmatprep.subr.bf16.mxu0 %v564_v12 }
  0x2d   : > { %567 = vmatpush3.bf16.xpose.msra.mxu0 %v564_v12 }
  0x2e   : > { %569 = vmatprep.subr.bf16.mxu0 %v568_v15 }
  0x35   : > { %571 = vmatpush3.bf16.xpose.msra.mxu0 %v568_v15 }
  0x36   : > { %573 = vmatprep.subr.bf16.mxu0 %v572_v18 }
  0x3d   : > { %575 = vmatpush3.bf16.xpose.msra.mxu0 %v572_v18 }
  0x3e   : > { %577 = vmatprep.subr.bf16.mxu0 %v576_v21 }
  0x45   : > { %579 = vmatpush3.bf16.xpose.msra.mxu0 %v576_v21 }
  0x46   : > { %581 = vmatprep.subr.bf16.mxu0 %v580_v24 }
  0x4d   : > { %583 = vmatpush3.bf16.xpose.msra.mxu0 %v580_v24 }
  0x54   : > { %550 = vmatmul.mubr.f32.vlgmr.msra.gmra.mrb[0].mxu0 %v258_v25 }
 0x127   : > { %v551_v26 = vpop.f32.mrb[0].mxu0 }
 0x128   : > { %360 = vst [vmem:[%s247_s24 + $0x8] sm:$0xff] %v551_v26  ;;  %v341_v27 = vpop.f32.mrb[1].mxu0 }
 0x129   : > { %359 = vst [vmem:[%s247_s24] sm:$0xff] %v341_v27 }
 0x12a PF: > { %s12_s11 = sadd.s32 1, %s630_s11   ;;  %s711_s9 = smov %s626_s10 }
 0x12b   : > { %p9_p5 = scmp.ge.s32.totalorder %s12_s11, 5   ;;  %s712_s10 = smov %s714_s12 }
 0x12d   :  { %11 = sbr.rel (!%p9_p5) target bundleno = 2 (0x2), region = 69 }

</bundles_post_ra>
